<compile_context>
chip_gen: v6e
topology: v6e:2x2x1
jax: 0.10.0
libtpu: 0.0.40
codegen_flags: <defaults>
</compile_context>

<pallas_src>
import functools

import jax
import jax.numpy as jnp
import numpy as np
from jax.experimental import pallas as pl
from jax.experimental.pallas import tpu as pltpu


def _patches_kernel(x_ref, o_ref, *, C, p, nHb, nW):
    """x_ref: (1, C, nHb*p, nW*p) VMEM block; o_ref: (1, nHb*nW, C*p*p) VMEM block.

    out[(ph, pw), c*p*p + i*p + j] = x[c, ph*p + i, pw*p + j]
    """
    CP = C * p
    xb = x_ref[0]                               # (C, nHb*p, nW*p)
    a = xb.reshape(C, nHb, p, nW * p)           # (c, ph, i, (pw,j))   tile-aligned split
    a = jnp.transpose(a, (1, 0, 2, 3))          # (ph, c, i, (pw,j))   leading dims only
    a = a.reshape(nHb, CP, nW * p)              # (ph, (c,i), (pw,j))
    b = jnp.swapaxes(a, 1, 2)                   # (ph, (pw,j), (c,i))  batched minor transpose
    b = b.reshape(nHb, nW, p, CP)               # (ph, pw, j, (c,i))
    d = jnp.swapaxes(b, 2, 3)                   # (ph, pw, (c,i), j)   batched minor transpose
    # Single lane-dense store of the whole tile: (nHb*nW, D), D = C*p*p.
    o_ref[0] = d.reshape(nHb * nW, CP * p)


def _choose_tph(nH, nW, p, C, W, itemsize, budget_bytes=16 << 20):
    """Pick patch-rows per grid step.

    Largest Tph dividing nH whose double-buffered (in + out) footprint fits the
    budget, subject to (8,128) block legality when Tph < nH.  Whole-image blocks
    (Tph == nH) are always legal since block dims equal the full array dims.
    """
    row_bytes = 2 * C * p * W * itemsize            # input slab + output slab per patch-row
    max_t = max(1, budget_bytes // (2 * row_bytes))  # x2 for double buffering

    def legal(t):
        if nH % t:
            return False
        if t == nH:
            return True
        return (t * p) % 8 == 0 and (t * nW) % 8 == 0

    for t in range(min(nH, max_t), 0, -1):
        if legal(t):
            return t
    return nH


def image_to_patches(x, patch_size):
    """Pallas equivalent of ImageToPatches.forward.

    x: (B, C, H, W) array (NCHW, like PyTorch).
    returns: (B, (H//p)*(W//p), C*p*p)
    """
    assert x.ndim == 4
    B, C, H, W = x.shape
    p = patch_size
    assert H % p == 0 and W % p == 0
    nH, nW = H // p, W // p
    L, D = nH * nW, C * p * p
    itemsize = jnp.dtype(x.dtype).itemsize

    tph = _choose_tph(nH, nW, p, C, W, itemsize)
    grid = (B, nH // tph)
    kernel = functools.partial(_patches_kernel, C=C, p=p, nHb=tph, nW=nW)

    return pl.pallas_call(
        kernel,
        out_shape=jax.ShapeDtypeStruct((B, L, D), x.dtype),
        grid=grid,
        in_specs=[pl.BlockSpec((1, C, tph * p, W), lambda b, r: (b, 0, r, 0))],
        out_specs=pl.BlockSpec((1, tph * nW, D), lambda b, r: (b, r, 0)),
        compiler_params=pltpu.CompilerParams(
            dimension_semantics=("parallel", "parallel")),
        cost_estimate=pl.CostEstimate(
            flops=0, transcendentals=0,
            bytes_accessed=2 * B * C * H * W * itemsize),
    )(x)


if __name__ == "__main__":
    key = jax.random.PRNGKey(0)
    B, C, H, W = 2, 4, 16, 16
    patch_size = 8

    x = jax.random.normal(key, (B, C, H, W), dtype=jnp.float32)

    y = jax.block_until_ready(image_to_patches(x, patch_size))

    # Pure-JAX reference of torch.nn.Unfold(p, stride=p) + permute(0, 2, 1).
    nH, nW = H // patch_size, W // patch_size
    ref = x.reshape(B, C, nH, patch_size, nW, patch_size)
    ref = ref.transpose(0, 2, 4, 1, 3, 5).reshape(
        B, nH * nW, C * patch_size * patch_size
    )

    assert y.shape == (B, nH * nW, C * patch_size * patch_size)
    assert y.dtype == x.dtype
    np.testing.assert_array_equal(np.asarray(y), np.asarray(ref))

    print("KERNEL_OK")
</pallas_src>

<mosaic_0001>
module attributes {stable_mosaic.version = 11 : i64} {
  func.func @_patches_kernel(%arg0: i32, %arg1: i32, %arg2: memref<1x4x16x16xf32, #tpu.memory_space<vmem>>, %arg3: memref<1x4x256xf32, #tpu.memory_space<vmem>>) attributes {dimension_semantics = [#tpu.dimension_semantics<parallel>, #tpu.dimension_semantics<parallel>], iteration_bounds = array<i64: 2, 1>, scalar_prefetch = 0 : i64, scratch_operands = 0 : i64, tpu.core_type = #tpu.core_type<tc>, window_params = [{transform_indices = @transform_0, window_bounds = array<i64: 1, 4, 16, 16>}, {transform_indices = @transform_1, window_bounds = array<i64: 1, 4, 256>}]} {
    %c0 = arith.constant 0 : index
    %c0_0 = arith.constant 0 : index
    %c0_1 = arith.constant 0 : index
    %c0_2 = arith.constant 0 : index
    %0 = vector.load %arg2[%c0, %c0_0, %c0_1, %c0_2] : memref<1x4x16x16xf32, #tpu.memory_space<vmem>>, vector<1x4x16x16xf32>
    %1 = vector.shape_cast %0 : vector<1x4x16x16xf32> to vector<4x16x16xf32>
    %2 = vector.shape_cast %1 : vector<4x16x16xf32> to vector<4x2x8x16xf32>
    %3 = tpu.transpose %2, [1, 0, 2, 3] : vector<4x2x8x16xf32> -> vector<2x4x8x16xf32>
    %4 = vector.shape_cast %3 : vector<2x4x8x16xf32> to vector<2x32x16xf32>
    %5 = tpu.transpose %4, [0, 2, 1] : vector<2x32x16xf32> -> vector<2x16x32xf32>
    %6 = vector.shape_cast %5 : vector<2x16x32xf32> to vector<2x2x8x32xf32>
    %7 = tpu.transpose %6, [0, 1, 3, 2] : vector<2x2x8x32xf32> -> vector<2x2x32x8xf32>
    %8 = vector.shape_cast %7 : vector<2x2x32x8xf32> to vector<4x256xf32>
    %c0_3 = arith.constant 0 : index
    %c0_4 = arith.constant 0 : index
    %c0_5 = arith.constant 0 : index
    %9 = vector.load %arg3[%c0_3, %c0_4, %c0_5] : memref<1x4x256xf32, #tpu.memory_space<vmem>>, vector<1x4x256xf32>
    %10 = vector.shape_cast %9 : vector<1x4x256xf32> to vector<4x256xf32>
    %11 = vector.shape_cast %8 : vector<4x256xf32> to vector<1x4x256xf32>
    tpu.vector_store %arg3[%c0_3, %c0_4, %c0_5], %11 {strides = array<i32>} : memref<1x4x256xf32, #tpu.memory_space<vmem>>, vector<1x4x256xf32>,
    return
  }
  func.func @transform_0(%arg0: i32, %arg1: i32) -> (i32, i32, i32, i32) {
    %c0_i32 = arith.constant 0 : i32
    %c0_i32_0 = arith.constant 0 : i32
    %c0_i32_1 = arith.constant 0 : i32
    return %arg0, %c0_i32, %arg1, %c0_i32_0 : i32, i32, i32, i32
  }
  func.func @transform_1(%arg0: i32, %arg1: i32) -> (i32, i32, i32) {
    %c0_i32 = arith.constant 0 : i32
    %c0_i32_0 = arith.constant 0 : i32
    return %arg0, %arg1, %c0_i32 : i32, i32, i32
  }
}

</mosaic_0001>

<bundles_post_ra>
// kernel: tpu_custom_call.1
= control target key start
LH: loop header
LB: loop body
LE: loop exit
PB: predicated region body
PF: predicated region fallthrough
CT: control target
= control target key end

     0   :  { %6 = vsyncpa [#allocation3], 0  ;;  %s1363_s0 = inlined_call_operand.hbm [shape: f32[2,4,16,16], index: 0, kind: input, shape index: {}]   ;;  %s1364_s1 = inlined_call_operand.hbm [shape: f32[2,4,256], index: 1, kind: output, shape index: {}]  }
   0x1   :  { %8 = vsyncpa [#allocation3 + $0x1], 0 }
   0x2   :  { %9 = vsyncpa [#allocation4], 0 }
   0x3   :  { %11 = vsyncpa [#allocation4 + $0x1], 0  ;;  %s1138_s6 = smov 0   ;;  %s1140_s7 = smov 0  }
   0x4   :  { %s1142_s8 = smov 0   ;;  %s1144_s9 = smov 0  }
   0x5   :  { %s1146_s10 = smov 0   ;;  %s1148_s11 = smov 0  }
   0x6 LB: > { %s897_s12 = sadd.s32 4294967295, %s1104_s11   ;;  %s898_s13 = sadd.s32 4294967294, %s1104_s11   ;;  %s1104_s11 = sphi %s1148_s11, %s17_s11   ;;  %s1100_s10 = sphi %s1146_s10, %s1375_s10   ;;  %s1096_s9 = sphi %s1144_s9, %s1374_s9   ;;  %s1092_s8 = sphi %s1142_s8, %s1373_s8   ;;  %s1088_s7 = sphi %s1140_s7, %s1372_s7   ;;  %s1084_s6 = sphi %s1138_s6, %s1371_s6  }
   0x7   : > { %s29_s14 = sadd.s32 1, %s1100_s10  ;;  %s38_s15 = sadd.s32 1, %s1092_s8 }
   0x8   : > { %p31_p0 = scmp.ge.s32.totalorder %s29_s14, 2  ;;  %p45_p1 = scmp.ne.s32.totalorder %s1092_s8, %s1088_s7 }
   0x9   : > { %p46_p2 = scmp.eq.s32.totalorder %s1104_s11, 0  ;;  %p51_p3 = scmp.ne.s32.totalorder %s1088_s7, %s1084_s6 }
   0xa   : > { %s1377_s14 = smov (%p31_p0, %s29_s14), 0  ;;  %p52_p5 = scmp.eq.s32.totalorder %s897_s12, 0 }
   0xb   : > { %p1179_p4 = por %p46_p2, %p45_p1  ;;  %s33_s17 = ssub.s32 %s1100_s10, %s1377_s14 }
   0xc   : > { %p77_p6 = scmp.eq.s32.totalorder %s897_s12, 1  ;;  %p36_p7 = scmp.eq.s32.totalorder %s33_s17, 0 }
   0xd   : > { %p1185_p8 = por %p52_p5, %p51_p3  ;;  %p83_p10 = scmp.eq.s32.totalorder %s898_s13, 1 }
   0xe   : > { %p1189_p9 = por %p77_p6, %p45_p1  ;;  %p926_p13 = scmp.lt.s32.totalorder %s1104_s11, 2 }
   0xf   : > { %s1194_s20 = scalar_select %p36_p7, %s1092_s8, %s38_s15  }
  0x10   : > { %p1196_p11 = por %p83_p10, %p51_p3  ;;  %s103_s22 = sand.u32 1, %s1092_s8  }
  0x11   : > { %s901_s23 = sshll.u32 %s103_s22, 6  ;;  %s912_s24 = sshll.u32 %s1100_s10, 10 }
  0x12   : > { %s115_s27 = scalar_lea.hbm %s1363_s0, %s912_s24  ;;  %s107_s28 = scalar_lea.vmem [#allocation2], %s901_s23 }
  0x13   : > { %s116_s29 = sshll.u32 %s107_s28, 4  ;;  %p1209_p0 = pnand %p926_p13, %p1179_p4  ;;  %s117_s29 = int_to_ptr.vmem [resolvable:$true] %s116_s29 }
  0x14   : > { %p904_p1 = scmp.ge.s32.totalorder %s1104_s11, 1  ;;  %s104_s2 = scalar_lea.sflag [#allocation3], %s103_s22 }
  0x15   : > { %p998_p2 = pneg %p1209_p0  ;;  %s1009_s3 = scalar_lea.vmem %s117_s29, 1024 }
  0x16   : > { %p1010_p3 = scmp.ne.s32.totalorder %s117_s29, %s1009_s3  ;;  %s1106_s4 = smov [#allocation2]  }
  0x17   : > { %s1014_s5 = sshll.u32 %s1106_s4, 4  ;;  %s1015_s5 = int_to_ptr.vmem [resolvable:$false] %s1014_s5 }
  0x18   : > { %p1012_p5 = pnand %p1010_p3, %p998_p2  ;;  %s1016_s12 = scalar_lea.vmem %s1015_s5, 2048 }
  0x19   : > { %p1017_p7 = scmp.lt.s32.totalorder %s117_s29, %s1015_s5  ;;  %p1018_p10 = scmp.lt.s32.totalorder %s1016_s12, %s1009_s3 }
  0x1a   : > { %p1013_p6 = pneg %p1012_p5 }
  0x1b   : > { %p1019_p12 = por %p1018_p10, %p1017_p7 }
  0x1d   : > { %p1020_p4 = pnand %p1019_p12, %p1013_p6 }
  0x1f   : > { %1023 = shalt.err (!%p1020_p4)
}
  0x20   : > { %s1107_s13 = smov 128   ;;  %s1108_s15 = smov 8  }
  0x21   : > { %921 = dma.hbm_to_vmem [thread:$0]  (!%p1209_p0), %s115_s27, 1024, %s117_s29, %s104_s2, %s1107_s13, %s1107_s13, %s1108_s15  }
  0x22   : > { %p124_p13 = scmp.lt.s32.totalorder %s1104_s11, 3 }
  0x24   : > { %p125_p2 = pnand %p904_p1, %p124_p13 }
  0x25   : > { %s1222_s16 = sand.u32 (!%p125_p2), 1, %s1088_s7  }
  0x26   : > { %128 = sbr.rel (%p125_p2) target bundleno = 514 (0x202), region = 24  ;;  %s905_s17 = sshll.u32 (!%p125_p2), %s1222_s16, 6 }
  0x27   : > { %s131_s22 = scalar_lea.sflag (!%p125_p2), [#allocation3], %s1222_s16  ;;  %s134_s23 = scalar_lea.vmem (!%p125_p2), [#allocation2], %s905_s17 }
  0x2b   : > { %1075 = dma.done.wait (%p1185_p8), %s131_s22, 1024  }
  0x2c   : > { %1077 = vsyncadd (%p1185_p8), %s131_s22, 4294966272  ;;  %v154_v0 = vld [vmem:[%s134_s23] sm:$0xff]  ;;  %v155_v1 = vld [vmem:[%s134_s23 + $0x8] sm:$0xff]  ;;  %v1109_v17 = vmov 1983009808   ;;  %v359_v19 = vlaneseq  ;;  %s1111_s18 = smov 16  }
  0x2d   : > { %162 = vxpose.xlu0.b32.start [1/4] (short) (narrow) %v154_v0, 16  ;;  %v156_v2 = vld [vmem:[%s134_s23 + $0x10] sm:$0xff]  ;;  %194 = vxpose.xlu1.b32.start [1/4] (short) (narrow) %v155_v1, 16  ;;  %v157_v3 = vld [vmem:[%s134_s23 + $0x18] sm:$0xff]  ;;  %v158_v4 = vld [vmem:[%s134_s23 + $0x20] sm:$0xff]  ;;  %v357_v18 = vunpack.c.l.s4 %v1109_v17  ;;  %v1112_v58 = vmov 0.0  }
  0x2e   : > { %v159_v5 = vld [vmem:[%s134_s23 + $0x28] sm:$0xff]  ;;  %v160_v6 = vld [vmem:[%s134_s23 + $0x30] sm:$0xff]  ;;  %v161_v7 = vld [vmem:[%s134_s23 + $0x38] sm:$0xff]  ;;  %v360_v23 = vshrl.u32 %v359_v19, 7  ;;  %v1110_v24 = vmov 1934713408  }
  0x2f   : > { %v358_v22 = vunpack.c.0.s8 %v357_v18  ;;  %v389_v25 = vunpack.c.l.s4 %v1110_v24  ;;  %s1113_s24 = smov 32   ;;  %s1114_s25 = smov 8   ;;  %vm746_vm0 = vcmask 64512   ;;  %vm748_vm1 = vcmask 130048  }
  0x30   : > { %s1115_s26 = smov 48   ;;  %s1116_s27 = smov 24   ;;  %vm750_vm2 = vcmask 195584   ;;  %vm752_vm3 = vcmask 261120   ;;  %vm754_vm4 = vcmask 326656   ;;  %vm756_vm5 = vcmask 392192  }
  0x31   : > { %163 = vxpose.xlu0.b32.cont [2/4] (short) (narrow) %v156_v2, 16  ;;  %195 = vxpose.xlu1.b32.cont [2/4] (short) (narrow) %v157_v3, 16  ;;  %v1238_v28 = vsub.s32 %v358_v22, %v360_v23  ;;  %v390_v30 = vunpack.c.0.s8 %v389_v25  ;;  %s1117_s28 = smov 40   ;;  %s1118_s29 = smov 56   ;;  %vm758_vm6 = vcmask 457728   ;;  %vm760_vm7 = vcmask 523264  }
  0x32   : > { %s1119_s30 = smov 64   ;;  %s1120_s2 = smov 80   ;;  %vm762_vm8 = vcmask 588800   ;;  %vm764_vm9 = vcmask 654336   ;;  %vm766_vm10 = vcmask 719872   ;;  %vm768_vm11 = vcmask 785408  }
  0x33   : > { %v1245_v39 = vsub.s32 %v390_v30, %v360_v23  ;;  %s1121_s3 = smov 72   ;;  %s1122_s4 = smov 88   ;;  %vm772_vm12 = vcmask 916480   ;;  %vm770_vm13 = vcmask 850944   ;;  %vm774_vm14 = vcmask 982016  }
  0x34   : > { %s1123_s5 = smov 96   ;;  %s1124_s12 = smov 112  }
  0x35   : > { %164 = vxpose.xlu0.b32.cont [3/4] (short) (narrow) %v158_v4, 16  ;;  %196 = vxpose.xlu1.b32.cont [3/4] (short) (narrow) %v159_v5, 16  ;;  %s1125_s13 = smov 104   ;;  %s1126_s15 = smov 120  }
  0x36   : > { %s906_s17 = sshll.u32 %s1222_s16, 3  ;;  %s913_s22 = sshll.u32 %s1096_s9, 7 }
  0x37   : > { %s152_s23 = scalar_lea.vmem [#allocation5], %s906_s17  ;;  %s1127_s9 = smov [#allocation5]  }
  0x39   : > { %165 = vxpose.xlu0.b32.end [4/4] (short) (narrow) %v160_v6, 16  ;;  %197 = vxpose.xlu1.b32.end [4/4] (short) (narrow) %v161_v7, 16 }
  0xa9   : > { %v178_v8 = vpop.trf.xlu0  ;;  %v210_v10 = vpop.trf.xlu1 }
  0xaa   : > { %226 = vxpose.xlu0.b32.start.end [1/1] (short) (narrow) %v178_v8, 32 }
  0xad   : > { %v179_v9 = vpop.trf.xlu0  ;;  %v211_v11 = vpop.trf.xlu1 }
  0xae   : > { %258 = vxpose.xlu1.b32.start.end [1/1] (short) (narrow) %v179_v9, 32 }
  0xb7   : > { %290 = vxpose.xlu0.b32.start.end [1/1] (short) (narrow) %v210_v10, 32 }
  0xbb   : > { %322 = vxpose.xlu1.b32.start.end [1/1] (short) (narrow) %v211_v11, 32 }
 0x126   : > { %v242_v12 = vpop.trf.xlu0 }
 0x12a   : > { %v274_v13 = vpop.trf.xlu1  ;;  %v1230_v14 = vpop.trf.xlu0 }
 0x12e   : > { %v1232_v15 = vpop.trf.xlu1  ;;  %v244_v16 = vpop.trf.xlu0 }
 0x132   : > { %v276_v20 = vpop.trf.xlu1  ;;  %v1234_v21 = vpop.trf.xlu0 }
 0x136   : > { %v1236_v26 = vpop.trf.xlu1  ;;  %v306_v27 = vpop.trf.xlu0 }
 0x137   : > { %v354_v29 = vcombine.low %v242_v12, %v306_v27  ;;  %v355_v33 = vcombine.high %v242_v12, %v306_v27 }
 0x139   : > { %v362_v36 = vrot.slane %v354_v29, %v1238_v28  ;;  %v369_v42 = vrot.slane %v355_v33, %v1238_v28 }
 0x13a   : > { %v338_v31 = vpop.trf.xlu1  ;;  %v1240_v32 = vpop.trf.xlu0 }
 0x13b   : > { %v370_v34 = vcombine.low %v274_v13, %v338_v31  ;;  %v371_v35 = vcombine.high %v274_v13, %v338_v31  ;;  %v422_v6 = vcombine.low %v1230_v14, %v1240_v32 }
 0x13d   : > { %v378_v37 = vrot.slane %v370_v34, %v1238_v28  ;;  %v385_v38 = vrot.slane %v371_v35, %v1238_v28  ;;  %v430_v13 = vrot.slane %v422_v6, %v1238_v28 }
 0x13e   : > { %v1247_v40 = vpop.trf.xlu1  ;;  %v308_v41 = vpop.trf.xlu0 }
 0x13f   : > { %v386_v43 = vcombine.low %v362_v36, %v378_v37  ;;  %v387_v44 = vcombine.high %v362_v36, %v378_v37  ;;  %v402_v45 = vcombine.low %v369_v42, %v385_v38  ;;  %v491_v46 = vcombine.high %v244_v16, %v308_v41 }
 0x140   : > { %v490_v52 = vcombine.low %v244_v16, %v308_v41  ;;  %v403_v53 = vcombine.high %v369_v42, %v385_v38  ;;  %v438_v2 = vcombine.low %v1232_v15, %v1247_v40 }
 0x141   : > { %v401_v47 = vrot.slane %v387_v44, %v1245_v39  ;;  %v1252_v49 = vrot.slane %v386_v43, %v1245_v39  ;;  %v505_v54 = vrot.slane %v491_v46, %v1238_v28  ;;  %v410_v56 = vrot.slane %v402_v45, %v1245_v39 }
 0x142   : > { %v340_v48 = vpop.trf.xlu1  ;;  %v1264_v61 = vrot.slane %v490_v52, %v1238_v28  ;;  %v417_v62 = vrot.slane %v403_v53, %v1245_v39  ;;  %v446_v8 = vrot.slane %v438_v2, %v1238_v28  ;;  %v309_v9 = vpop.trf.xlu0  ;;  %v423_v45 = vcombine.high %v1230_v14, %v1240_v32 }
 0x143   : > { %v506_v50 = vcombine.low %v276_v20, %v340_v48  ;;  %v507_v51 = vcombine.high %v276_v20, %v340_v48  ;;  %631 = vrot.lane.b32.xlu1 %v401_v47, %s1111_s18  ;;  %v418_v59 = vcombine.high %v1252_v49, %v1112_v58  ;;  %v419_v3 = vcombine.high %v401_v47, %v1112_v58 }
 0x144   : > { %v420_v10 = vcombine.high %v410_v56, %v1112_v58  ;;  %v558_v16 = vcombine.low %v1234_v21, %v309_v9  ;;  %v454_v17 = vcombine.low %v430_v13, %v446_v8  ;;  %v421_v18 = vcombine.high %v417_v62, %v1112_v58 }
 0x145   : > { %v521_v55 = vrot.slane %v507_v51, %v1238_v28  ;;  %v1259_v57 = vrot.slane %v506_v50, %v1238_v28  ;;  %627 = vrot.lane.b32.xlu0 %v418_v59, %s1114_s25  ;;  %v455_v23 = vcombine.high %v430_v13, %v446_v8  ;;  %v559_v30 = vcombine.high %v1234_v21, %v309_v9 }
 0x146   : > { %v341_v7 = vpop.trf.xlu1  ;;  %v566_v22 = vrot.slane %v558_v16, %v1238_v28  ;;  %v462_v24 = vrot.slane %v454_v17, %v1245_v39  ;;  %v439_v21 = vcombine.high %v1232_v15, %v1247_v40  ;;  %v437_v40 = vrot.slane %v423_v45, %v1238_v28 }
 0x147   : > { %v538_v60 = vcombine.low %v505_v54, %v521_v55  ;;  %639 = vrot.lane.b32.xlu1 %v410_v56, %s1113_s24  ;;  %v523_v0 = vcombine.high %v1264_v61, %v1259_v57  ;;  %v539_v1 = vcombine.high %v505_v54, %v521_v55  ;;  %v574_v11 = vcombine.low %v1236_v26, %v341_v7 }
 0x148   : > { %v575_v25 = vcombine.high %v1236_v26, %v341_v7  ;;  %v469_v31 = vrot.slane %v455_v23, %v1245_v39  ;;  %v573_v36 = vrot.slane %v559_v30, %v1238_v28  ;;  %v486_v26 = vcombine.high %v462_v24, %v1112_v58 }
 0x149   : > { %v546_v63 = vrot.slane %v538_v60, %v1245_v39  ;;  %v553_v4 = vrot.slane %v539_v1, %v1245_v39  ;;  %v537_v5 = vrot.slane %v523_v0, %v1245_v39  ;;  %v582_v19 = vrot.slane %v574_v11, %v1238_v28 }
 0x14a   : > { %v589_v33 = vrot.slane %v575_v25, %v1238_v28  ;;  %v522_v41 = vcombine.low %v1264_v61, %v1259_v57  ;;  %v487_v42 = vcombine.high %v469_v31, %v1112_v58  ;;  %v453_v46 = vrot.slane %v439_v21, %v1238_v28 }
 0x14b   : > { %647 = vrot.lane.b32.xlu1 %v417_v62, %s1115_s26  ;;  %699 = vrot.lane.b32.xlu0 %v546_v63, %s1113_s24  ;;  %v555_v12 = vcombine.high %v537_v5, %v1112_v58  ;;  %v556_v20 = vcombine.high %v546_v63, %v1112_v58  ;;  %v590_v27 = vcombine.low %v566_v22, %v582_v19 }
 0x14c   : > { %v557_v29 = vcombine.high %v553_v4, %v1112_v58  ;;  %v591_v34 = vcombine.high %v566_v22, %v582_v19  ;;  %v606_v37 = vcombine.low %v573_v36, %v589_v33  ;;  %v607_v43 = vcombine.high %v573_v36, %v589_v33 }
 0x14d   : > { %v598_v35 = vrot.slane %v590_v27, %v1245_v39  ;;  %v530_v47 = vrot.slane %v522_v41, %v1245_v39  ;;  %v470_v48 = vcombine.low %v437_v40, %v453_v46  ;;  %v471_v52 = vcombine.high %v437_v40, %v453_v46 }
 0x14e   : > { %v605_v38 = vrot.slane %v591_v34, %v1245_v39  ;;  %v614_v44 = vrot.slane %v606_v37, %v1245_v39  ;;  %v621_v15 = vrot.slane %v607_v43, %v1245_v39 }
 0x14f   : > { %635 = vrot.lane.b32.xlu1 %v419_v3, %s1116_s27  ;;  %707 = vrot.lane.b32.xlu0 %v553_v4, %s1115_s26  ;;  %v554_v50 = vcombine.high %v530_v47, %v1112_v58  ;;  %v622_v14 = vcombine.high %v598_v35, %v1112_v58  ;;  %v478_v32 = vrot.slane %v470_v48, %v1245_v39  ;;  %s811_s26 = scalar_lea.hbm %s1364_s1, %s913_s22 }
 0x150   : > { %v623_v51 = vcombine.high %v605_v38, %v1112_v58  ;;  %v624_v53 = vcombine.high %v614_v44, %v1112_v58  ;;  %v485_v54 = vrot.slane %v471_v52, %v1245_v39  ;;  %v625_v55 = vcombine.high %v621_v15, %v1112_v58 }
 0x151   : > { %v488_v28 = vcombine.high %v478_v32, %v1112_v58 }
 0x152   : > { %v489_v56 = vcombine.high %v485_v54, %v1112_v58 }
 0x153   : > { %643 = vrot.lane.b32.xlu1 %v420_v10, %s1117_s28  ;;  %695 = vrot.lane.b32.xlu0 %v555_v12, %s1116_s27  ;;  %s797_s27 = scalar_lea.sflag [#allocation4], %s1222_s16 }
 0x157   : > { %651 = vrot.lane.b32.xlu1 %v421_v18, %s1118_s29  ;;  %703 = vrot.lane.b32.xlu0 %v556_v20, %s1117_s28 }
 0x15b   : > { %655 = vrot.lane.b32.xlu1 %v462_v24, %s1119_s30  ;;  %711 = vrot.lane.b32.xlu0 %v557_v29, %s1118_s29  ;;  %s1028_s29 = sshll.u32 %s1127_s9, 4  ;;  %s1029_s29 = int_to_ptr.vmem [resolvable:$false] %s1028_s29 }
 0x15f   : > { %663 = vrot.lane.b32.xlu1 %v469_v31, %s1120_s2  ;;  %715 = vrot.lane.b32.xlu0 %v598_v35, %s1119_s30  ;;  %s1030_s30 = scalar_lea.vmem %s1029_s29, 256 }
 0x163   : > { %659 = vrot.lane.b32.xlu1 %v486_v26, %s1121_s3  ;;  %723 = vrot.lane.b32.xlu0 %v605_v38, %s1120_s2 }
 0x167   : > { %667 = vrot.lane.b32.xlu1 %v487_v42, %s1122_s4  ;;  %731 = vrot.lane.b32.xlu0 %v614_v44, %s1123_s5 }
 0x16b   : > { %691 = vrot.lane.b32.xlu1 %v537_v5, %s1111_s18  ;;  %739 = vrot.lane.b32.xlu0 %v621_v15, %s1124_s12  ;;  %s813_s18 = sshll.u32 %s152_s23, 4  ;;  %s814_s18 = int_to_ptr.vmem [resolvable:$true] %s813_s18 }
 0x16c   : > { %s1024_s28 = scalar_lea.vmem %s814_s18, 128  ;;  %p1031_p1 = scmp.lt.s32.totalorder %s814_s18, %s1029_s29 }
 0x16d   : > { %p1025_p8 = scmp.ne.s32.totalorder %s814_s18, %s1024_s28  ;;  %p1032_p3 = scmp.lt.s32.totalorder %s1030_s30, %s1024_s28 }
 0x16f   : > { %687 = vrot.lane.b32.xlu1 %v554_v50, %s1114_s25  ;;  %719 = vrot.lane.b32.xlu0 %v622_v14, %s1121_s3  ;;  %p1026_p12 = pnand %p1025_p8, %p1189_p9  ;;  %p1033_p5 = por %p1032_p3, %p1031_p1 }
 0x171   : > { %p1027_p0 = pneg %p1026_p12 }
 0x173   : > { %671 = vrot.lane.b32.xlu1 %v478_v32, %s1123_s5  ;;  %727 = vrot.lane.b32.xlu0 %v623_v51, %s1122_s4  ;;  %p1034_p6 = pnand %p1033_p5, %p1027_p0 }
 0x177   : > { %675 = vrot.lane.b32.xlu1 %v488_v28, %s1125_s13  ;;  %735 = vrot.lane.b32.xlu0 %v624_v53, %s1125_s13 }
 0x17b   : > { %679 = vrot.lane.b32.xlu1 %v485_v54, %s1124_s12  ;;  %743 = vrot.lane.b32.xlu0 %v625_v55, %s1126_s15 }
 0x17f   : > { %683 = vrot.lane.b32.xlu1 %v489_v56, %s1126_s15 }
 0x1b5   : > { %v632_v57 = vpop.permute.xlu1 %631 }
 0x1b7   : > { %v628_v60 = vpop.permute.xlu0 %627 }
 0x1b8   : > { %v747_v11 = vsel %vm746_vm0, %v1252_v49, %v628_v60 }
 0x1b9   : > { %v640_v59 = vpop.permute.xlu1 %639  ;;  %v749_v16 = vsel %vm748_vm1, %v747_v11, %v632_v57 }
 0x1bd   : > { %v648_v61 = vpop.permute.xlu1 %647  ;;  %v700_v62 = vpop.permute.xlu0 %699 }
 0x1c1   : > { %v636_v63 = vpop.permute.xlu1 %635  ;;  %v708_v0 = vpop.permute.xlu0 %707 }
 0x1c2   : > { %v751_v17 = vsel %vm750_vm2, %v749_v16, %v636_v63 }
 0x1c3   : > { %v753_v22 = vsel %vm752_vm3, %v751_v17, %v640_v59 }
 0x1c5   : > { %v644_v1 = vpop.permute.xlu1 %643  ;;  %v696_v2 = vpop.permute.xlu0 %695 }
 0x1c6   : > { %v755_v24 = vsel %vm754_vm4, %v753_v22, %v644_v1 }
 0x1c7   : > { %v757_v31 = vsel %vm756_vm5, %v755_v24, %v648_v61 }
 0x1c9   : > { %v652_v3 = vpop.permute.xlu1 %651  ;;  %v704_v4 = vpop.permute.xlu0 %703 }
 0x1ca   : > { %v759_v34 = vsel %vm758_vm6, %v757_v31, %v652_v3 }
 0x1cd   : > { %v656_v39 = vpop.permute.xlu1 %655  ;;  %v712_v5 = vpop.permute.xlu0 %711 }
 0x1ce   : > { %v761_v36 = vsel %vm760_vm7, %v759_v34, %v656_v39 }
 0x1d1   : > { %v664_v6 = vpop.permute.xlu1 %663  ;;  %v716_v7 = vpop.permute.xlu0 %715 }
 0x1d5   : > { %v660_v8 = vpop.permute.xlu1 %659  ;;  %v724_v9 = vpop.permute.xlu0 %723 }
 0x1d6   : > { %v763_v38 = vsel %vm762_vm8, %v761_v36, %v660_v8 }
 0x1d7   : > { %v765_v44 = vsel %vm764_vm9, %v763_v38, %v664_v6 }
 0x1d9   : > { %v668_v58 = vpop.permute.xlu1 %667  ;;  %v732_v10 = vpop.permute.xlu0 %731 }
 0x1dd   : > { %v692_v12 = vpop.permute.xlu1 %691  ;;  %v740_v13 = vpop.permute.xlu0 %739 }
 0x1e1   : > { %v688_v18 = vpop.permute.xlu1 %687  ;;  %v720_v20 = vpop.permute.xlu0 %719 }
 0x1e2   : > { %v776_v19 = vsel %vm746_vm0, %v530_v47, %v688_v18  ;;  %v767_v47 = vsel %vm766_vm10, %v765_v44, %v668_v58 }
 0x1e3   : > { %v777_v23 = vsel %vm748_vm1, %v776_v19, %v692_v12 }
 0x1e4   : > { %v778_v25 = vsel %vm750_vm2, %v777_v23, %v696_v2 }
 0x1e5   : > { %v779_v27 = vsel %vm752_vm3, %v778_v25, %v700_v62  ;;  %v672_v49 = vpop.permute.xlu1 %671  ;;  %v728_v30 = vpop.permute.xlu0 %727 }
 0x1e6   : > { %v780_v29 = vsel %vm754_vm4, %v779_v27, %v704_v4  ;;  %v769_v40 = vsel %vm768_vm11, %v767_v47, %v672_v49 }
 0x1e7   : > { %v781_v33 = vsel %vm756_vm5, %v780_v29, %v708_v0 }
 0x1e8   : > { %v782_v35 = vsel %vm758_vm6, %v781_v33, %v712_v5 }
 0x1e9   : > { %v783_v26 = vsel %vm760_vm7, %v782_v35, %v716_v7  ;;  %v676_v37 = vpop.permute.xlu1 %675  ;;  %v736_v42 = vpop.permute.xlu0 %735 }
 0x1ea   : > { %v784_v21 = vsel %vm762_vm8, %v783_v26, %v720_v20  ;;  %v771_v50 = vsel %vm770_vm13, %v769_v40, %v676_v37 }
 0x1eb   : > { %v785_v41 = vsel %vm764_vm9, %v784_v21, %v724_v9 }
 0x1ec   : > { %v786_v43 = vsel %vm766_vm10, %v785_v41, %v728_v30 }
 0x1ed   : > { %v787_v45 = vsel %vm768_vm11, %v786_v43, %v732_v10  ;;  %v680_v46 = vpop.permute.xlu1 %679  ;;  %v744_v32 = vpop.permute.xlu0 %743 }
 0x1ee   : > { %v788_v15 = vsel %vm770_vm13, %v787_v45, %v736_v42  ;;  %v773_v14 = vsel %vm772_vm12, %v771_v50, %v680_v46 }
 0x1ef   : > { %v789_v48 = vsel %vm772_vm12, %v788_v15, %v740_v13 }
 0x1f0   : > { %v790_v52 = vsel %vm774_vm14, %v789_v48, %v744_v32 }
 0x1f1   : > { %v684_v51 = vpop.permute.xlu1 %683 }
 0x1f2   : > { %v775_v28 = vsel %vm774_vm14, %v773_v14, %v684_v51 }
 0x1f3   : > { %v793_v53 = vcombine.low %v775_v28, %v790_v52 }
 0x1f5   : > { %795 = vst [vmem:[%s152_s23] sm:$0xff] %v793_v53 }
 0x1f6   : > { %1037 = shalt.err (!%p1034_p6)
}
 0x1f7   : > { %s1038_s2 = scalar_lea.hbm %s811_s26, 128  ;;  %s1042_s4 = scalar_lea.hbm %s1364_s1, 256 }
 0x1f8   : > { %p1039_p7 = scmp.ne.s32.totalorder %s811_s26, %s1038_s2  ;;  %p1043_p13 = scmp.lt.s32.totalorder %s811_s26, %s1364_s1 }
 0x1f9   : > { %p1044_p2 = scmp.lt.s32.totalorder %s1042_s4, %s1038_s2 }
 0x1fa   : > { %p1040_p10 = pnand %p1039_p7, %p1189_p9 }
 0x1fb   : > { %p1045_p8 = por %p1044_p2, %p1043_p13 }
 0x1fc   : > { %p1041_p4 = pneg %p1040_p10 }
 0x1fe   : > { %p1046_p12 = pnand %p1045_p8, %p1041_p4 }
 0x200   : > { %1049 = shalt.err (!%p1046_p12)
}
 0x201   : > { %916 = dma.vmem_to_hbm [thread:$0]  (%p1189_p9), %s814_s18, 128, %s811_s26, %s797_s27  }
 0x202 PF: > { %s825_s13 = sand.u32 1, %s1084_s6   ;;  %p1370_p0 = scmp.ge.s32.totalorder %s1104_s11, 2 }
 0x203   : > { %s826_s15 = scalar_lea.sflag [#allocation4], %s825_s13 }
 0x204   : > { %p923_p1 = pnand %p1370_p0, %p1196_p11 }
 0x206   : > { %p924_p3 = pneg %p923_p1 }
 0x208   : > { %1079 = dma.done.wait (%p924_p3), %s826_s15, 128  }
 0x209   : > { %1081 = vsyncadd (%p924_p3), %s826_s15, 4294967168  ;;  %s17_s11 = sadd.s32 1, %s1104_s11   ;;  %s1371_s6 = smov %s1088_s7 }
 0x20a   : > { %p14_p5 = scmp.ge.s32.totalorder %s17_s11, 4   ;;  %s1372_s7 = smov %s1092_s8 }
 0x20b   : > { %s1373_s8 = smov %s1194_s20  ;;  %s1374_s9 = smov %s1100_s10 }
 0x20c   : > { %s1375_s10 = smov %s1377_s14  ;;  %16 = sbr.rel (!%p14_p5) target bundleno = 6 (0x6), region = 69 }
 0x211   :  { %831 = vsyncpa [#allocation3], 1 }
 0x212   :  { %833 = vsyncpa [#allocation3 + $0x1], 1 }
 0x213   :  { %834 = vsyncpa [#allocation4], 1 }
 0x214   :  { %836 = vsyncpa [#allocation4 + $0x1], 1 }

</bundles_post_ra>
